<compile_context>
chip_gen: v7x
topology: tpu7x:2x2x1
jax: 0.10.0
libtpu: 0.0.40
codegen_flags: <defaults>
</compile_context>

<pallas_src>
import functools
import math

import jax
import jax.numpy as jnp
from jax import lax
from jax.experimental import pallas as pl
from jax.experimental.pallas import tpu as pltpu


def _round_up(x: int, m: int) -> int:
    return (x + m - 1) // m * m


def _fused_heads_kernel(s_ref, w_ref, b_ref, out_ref, *, action_size, n_pad):
    # s: (TB, F) bf16 | w: (F, Npad) bf16 | b: (1, Npad) f32 | out: (TB, Npad) f32
    # Columns [0:A] = log_softmax(pi), column [A] = tanh(v), remaining columns = 0.
    z = jnp.dot(s_ref[...], w_ref[...], preferred_element_type=jnp.float32) + b_ref[...]

    col = lax.broadcasted_iota(jnp.int32, z.shape, 1)
    is_pi = col < action_size

    # log_softmax over the pi columns only; padded columns forced to -inf so they
    # contribute exp(-inf) = 0 to the sum and never win the max.
    neg_inf = jnp.float32(-jnp.inf)
    logits = jnp.where(is_pi, z, neg_inf)
    m = jnp.max(logits, axis=1, keepdims=True)
    shifted = logits - m
    lse = jnp.log(jnp.sum(jnp.exp(shifted), axis=1, keepdims=True))
    log_pi = jnp.where(is_pi, shifted - lse, jnp.float32(0.0))   # (TB, Npad), 0 outside pi

    # tanh only on the single 128-lane group that contains the value column A.
    g = (action_size // 128) * 128                      # static
    zg = z[:, g:g + 128]                                # static slice, one lane group
    colg = col[:, g:g + 128]
    vg = jnp.where(colg == action_size, jnp.tanh(zg), log_pi[:, g:g + 128])

    if n_pad == 128:
        out = vg
    else:
        out = jnp.concatenate([log_pi[:, :g], vg, log_pi[:, g + 128:]], axis=1)

    out_ref[...] = out.astype(out_ref.dtype)


def pack_params(w_pi, b_pi, w_v, b_v):
    """Pack both heads into one lane-dense weight/bias. Call ONCE (hoisted out of forward)."""
    F, A = w_pi.shape
    n_pad = max(128, _round_up(A + 1, 128))
    w = (jnp.zeros((F, n_pad), jnp.float32)
         .at[:, :A].set(w_pi)
         .at[:, A].set(jnp.reshape(w_v, (F,))))
    b = (jnp.zeros((1, n_pad), jnp.float32)
         .at[:, :A].set(jnp.reshape(b_pi, (1, A)))
         .at[:, A].set(jnp.reshape(b_v, ())))
    # bf16 weight -> halves pinned VMEM + weight DMA; bias stays f32 (added to f32 accumulator).
    return w.astype(jnp.bfloat16), b, A, n_pad


def linear_model_forward(x, packed):
    """x: (B, H, W) float32. Returns (log_softmax(pi), tanh(v)) matching the PyTorch module."""
    w, b, A, n_pad = packed
    F = w.shape[0]
    B = x.shape[0]

    # Batch tiling: up to 512 rows per grid step (multiple of 8 sublanes).
    tb = min(512, _round_up(B, 8))
    b_pad = _round_up(B, tb)

    # Single pass over the activations: reshape + bf16 cast (+ pad only if actually needed).
    s = x.reshape(B, -1)
    if b_pad != B:
        s = jnp.zeros((b_pad, F), jnp.bfloat16).at[:B].set(s.astype(jnp.bfloat16))
    else:
        s = s.astype(jnp.bfloat16)

    # VMEM budget: double-buffered bf16 input tile + double-buffered f32 output tile
    # + pinned bf16 weight + f32 bias, with headroom. Explicit so large tb never trips
    # the 32 MiB default scoped limit (v7x physical cap is 64 MiB per TC).
    vmem_bytes = (2 * tb * F * 2          # 2x (tb, F) bf16 input
                  + 2 * tb * n_pad * 4    # 2x (tb, n_pad) f32 output
                  + F * n_pad * 2         # pinned bf16 fused weight
                  + n_pad * 4)            # pinned f32 bias
    vmem_limit = min(2 * vmem_bytes + (1 << 20), 64 << 20)

    kernel = functools.partial(_fused_heads_kernel, action_size=A, n_pad=n_pad)
    out = pl.pallas_call(
        kernel,
        out_shape=jax.ShapeDtypeStruct((b_pad, n_pad), jnp.float32),
        grid_spec=pltpu.PrefetchScalarGridSpec(
            num_scalar_prefetch=0,
            grid=(b_pad // tb,),
            in_specs=[
                pl.BlockSpec((tb, F), lambda i: (i, 0)),     # streamed bf16 batch tiles
                pl.BlockSpec((F, n_pad), lambda i: (0, 0)),  # fused bf16 weights, pinned in VMEM
                pl.BlockSpec((1, n_pad), lambda i: (0, 0)),  # fused f32 bias, pinned in VMEM
            ],
            out_specs=pl.BlockSpec((tb, n_pad), lambda i: (i, 0)),
        ),
        compiler_params=pltpu.CompilerParams(
            dimension_semantics=("parallel",),   # shard batch grid across TCs (v7x)
            vmem_limit_bytes=int(vmem_limit),
        ),
    )(s, w, b)

    log_pi = out[:B, :A]
    v = out[:B, A:A + 1]
    return log_pi, v


def init_params(key, obs_size, action_size):
    """Deterministic init mimicking nn.Linear default (uniform +-1/sqrt(fan_in))."""
    F = obs_size[0] * obs_size[1]
    k1, k2, k3, k4 = jax.random.split(key, 4)
    bound = 1.0 / math.sqrt(F)
    # stored transposed relative to torch: (in_features, out_features)
    w_pi = jax.random.uniform(k1, (F, action_size), jnp.float32, -bound, bound)
    b_pi = jax.random.uniform(k2, (1, action_size), jnp.float32, -bound, bound)
    w_v = jax.random.uniform(k3, (F, 1), jnp.float32, -bound, bound)
    b_v = jax.random.uniform(k4, (1, 1), jnp.float32, -bound, bound)
    return w_pi, b_pi, w_v, b_v


if __name__ == "__main__":
    key = jax.random.PRNGKey(0)
    kx, kp = jax.random.split(key)

    batch = 2
    obs_size = (8, 16)       # observation_size tuple -> F = 128
    action_size = 16

    x = jax.random.normal(kx, (batch,) + obs_size, dtype=jnp.float32)
    w_pi, b_pi, w_v, b_v = init_params(kp, obs_size, action_size)

    packed = pack_params(w_pi, b_pi, w_v, b_v)   # one-time packing, reused every forward
    log_pi, v = linear_model_forward(x, packed)
    jax.block_until_ready((log_pi, v))

    # correctness check against plain-JAX f32 reference
    # (kernel uses bf16 MXU operands with f32 accumulation -> loose tolerance)
    s = x.reshape(batch, -1)
    pi_ref = s @ w_pi + b_pi
    log_pi_ref = jax.nn.log_softmax(pi_ref, axis=1)
    v_ref = jnp.tanh(s @ w_v + b_v)
    assert log_pi.shape == (batch, action_size) and v.shape == (batch, 1)
    assert jnp.allclose(log_pi, log_pi_ref, atol=2e-2), "log_softmax mismatch"
    assert jnp.allclose(v, v_ref, atol=2e-2), "tanh(v) mismatch"

    print("KERNEL_OK")
</pallas_src>

<mosaic_0001>
module attributes {stable_mosaic.version = 11 : i64} {
  func.func @_fused_heads_kernel(%arg0: i32, %arg1: memref<8x128xbf16, #tpu.memory_space<vmem>>, %arg2: memref<128x128xbf16, #tpu.memory_space<vmem>>, %arg3: memref<1x128xf32, #tpu.memory_space<vmem>>, %arg4: memref<8x128xf32, #tpu.memory_space<vmem>>) attributes {dimension_semantics = [#tpu.dimension_semantics<parallel>], iteration_bounds = array<i64: 1>, scalar_prefetch = 0 : i64, scratch_operands = 0 : i64, tpu.core_type = #tpu.core_type<tc>, window_params = [{transform_indices = @transform_0, window_bounds = array<i64: 8, 128>}, {pipeline_mode = #tpu.pipeline_mode<synchronous>, transform_indices = @transform_1, window_bounds = array<i64: 128, 128>}, {pipeline_mode = #tpu.pipeline_mode<synchronous>, transform_indices = @transform_2, window_bounds = array<i64: 1, 128>}, {transform_indices = @transform_3, window_bounds = array<i64: 8, 128>}]} {
    %c0 = arith.constant 0 : index
    %c0_0 = arith.constant 0 : index
    %0 = vector.load %arg1[%c0, %c0_0] : memref<8x128xbf16, #tpu.memory_space<vmem>>, vector<8x128xbf16>
    %c0_1 = arith.constant 0 : index
    %c0_2 = arith.constant 0 : index
    %1 = vector.load %arg2[%c0_1, %c0_2] : memref<128x128xbf16, #tpu.memory_space<vmem>>, vector<128x128xbf16>
    %cst = arith.constant dense<0.000000e+00> : vector<8x128xf32>
    %2 = tpu.matmul %0, %1, %cst {dimension_numbers = #tpu.dot_dimension_numbers<[1], [0], [0], [1], [0, 0, 1, 1], [], []>} : vector<8x128xbf16>, vector<128x128xbf16>, vector<8x128xf32> -> vector<8x128xf32>
    %c0_3 = arith.constant 0 : index
    %c0_4 = arith.constant 0 : index
    %3 = vector.load %arg3[%c0_3, %c0_4] : memref<1x128xf32, #tpu.memory_space<vmem>>, vector<1x128xf32>
    %4 = vector.broadcast %3 : vector<1x128xf32> to vector<8x128xf32>
    %5 = arith.addf %2, %4 : vector<8x128xf32>
    %6 = tpu.iota {dimensions = array<i32: 1>} : vector<8x128xi32>
    %c16_i32 = arith.constant 16 : i32
    %7 = vector.broadcast %c16_i32 : i32 to vector<8x128xi32>
    %8 = arith.cmpi slt, %6, %7 : vector<8x128xi32>
    %cst_5 = arith.constant 0xFF800000 : f32
    %9 = vector.broadcast %cst_5 : f32 to vector<8x128xf32>
    %10 = arith.select %8, %5, %9 : vector<8x128xi1>, vector<8x128xf32>
    %cst_6 = arith.constant dense<0xFF800000> : vector<8xf32>
    %11 = vector.multi_reduction <maximumf>, %10, %cst_6 [1] : vector<8x128xf32> to vector<8xf32>
    %12 = vector.shape_cast %11 : vector<8xf32> to vector<8x1xf32>
    %13 = vector.broadcast %12 : vector<8x1xf32> to vector<8x128xf32>
    %14 = arith.subf %10, %13 : vector<8x128xf32>
    %15 = math.exp %14 : vector<8x128xf32>
    %cst_7 = arith.constant dense<0.000000e+00> : vector<8xf32>
    %16 = vector.multi_reduction <add>, %15, %cst_7 [1] : vector<8x128xf32> to vector<8xf32>
    %17 = vector.shape_cast %16 : vector<8xf32> to vector<8x1xf32>
    %18 = math.log %17 : vector<8x1xf32>
    %19 = vector.broadcast %18 : vector<8x1xf32> to vector<8x128xf32>
    %20 = arith.subf %14, %19 : vector<8x128xf32>
    %cst_8 = arith.constant 0.000000e+00 : f32
    %21 = vector.broadcast %cst_8 : f32 to vector<8x128xf32>
    %22 = arith.select %8, %20, %21 : vector<8x128xi1>, vector<8x128xf32>
    %c16_i32_9 = arith.constant 16 : i32
    %23 = vector.broadcast %c16_i32_9 : i32 to vector<8x128xi32>
    %24 = arith.cmpi eq, %6, %23 : vector<8x128xi32>
    %25 = math.tanh %5 : vector<8x128xf32>
    %26 = arith.select %24, %25, %22 : vector<8x128xi1>, vector<8x128xf32>
    %c0_10 = arith.constant 0 : index
    %c0_11 = arith.constant 0 : index
    %27 = vector.load %arg4[%c0_10, %c0_11] : memref<8x128xf32, #tpu.memory_space<vmem>>, vector<8x128xf32>
    tpu.vector_store %arg4[%c0_10, %c0_11], %26 {strides = array<i32>} : memref<8x128xf32, #tpu.memory_space<vmem>>, vector<8x128xf32>,
    return
  }
  func.func @transform_0(%arg0: i32) -> (i32, i32) {
    %c0_i32 = arith.constant 0 : i32
    %c0_i32_0 = arith.constant 0 : i32
    return %arg0, %c0_i32 : i32, i32
  }
  func.func @transform_1(%arg0: i32) -> (i32, i32) {
    %c0_i32 = arith.constant 0 : i32
    %c0_i32_0 = arith.constant 0 : i32
    %c0_i32_1 = arith.constant 0 : i32
    return %c0_i32, %c0_i32_0 : i32, i32
  }
  func.func @transform_2(%arg0: i32) -> (i32, i32) {
    %c0_i32 = arith.constant 0 : i32
    %c0_i32_0 = arith.constant 0 : i32
    %c0_i32_1 = arith.constant 0 : i32
    return %c0_i32, %c0_i32_0 : i32, i32
  }
  func.func @transform_3(%arg0: i32) -> (i32, i32) {
    %c0_i32 = arith.constant 0 : i32
    %c0_i32_0 = arith.constant 0 : i32
    return %arg0, %c0_i32 : i32, i32
  }
}

</mosaic_0001>

<bundles_post_ra>
// kernel: tpu_custom_call.1
= control target key start
LH: loop header
LB: loop body
LE: loop exit
PB: predicated region body
PF: predicated region fallthrough
CT: control target
= control target key end

     0   :  { %8 = vsyncpa [#allocation3], 0  ;;  %s395_s0 = inlined_call_operand.hbm [shape: bf16[8,128], index: 0, kind: input, shape index: {}]   ;;  %s396_s1 = inlined_call_operand.hbm [shape: bf16[128,128], index: 1, kind: input, shape index: {}]   ;;  %s397_s2 = inlined_call_operand.vmem [shape: f32[1,128], index: 2, kind: input, shape index: {}]   ;;  %s398_s3 = inlined_call_operand.hbm [shape: f32[8,128], index: 3, kind: output, shape index: {}]  }
   0x1   :  { %9 = vsyncpa [#allocation6], 0 }
   0x2   :  { %10 = vsyncpa [#allocation4], 0  ;;  %s320_s12 = smov [#allocation2]   ;;  %s321_s14 = smov [#allocation5]  }
   0x3   :  { %s17_s13 = sshll.u32 %s320_s12, 4  ;;  %s26_s15 = sshll.u32 %s321_s14, 4  ;;  %s18_s13 = int_to_ptr.vmem [resolvable:$true] %s17_s13  ;;  %s347_s15 = int_to_ptr.vmem [resolvable:$true] %s26_s15 }
   0x4   :  { %s248_s18 = scalar_lea.hbm %s395_s0, 64 }
   0x5   :  { %p249_p0 = scmp.ne.s32.totalorder %s395_s0, %s248_s18  ;;  %p252_p1 = scmp.lt.u32.totalorder %s248_s18, %s395_s0 }
   0x7   :  { %p254_p2 = pnand %p252_p1, %p249_p0 }
   0x9   :  { %257 = shalt.err (!%p254_p2)
}
   0xa   :  { %s258_s23 = scalar_lea.vmem %s18_s13, 64  ;;  %p263_p4 = scmp.lt.s32.totalorder %s18_s13, %s18_s13 }
   0xb   :  { %p259_p3 = scmp.ne.s32.totalorder %s18_s13, %s258_s23  ;;  %p264_p5 = scmp.lt.s32.totalorder %s258_s23, %s258_s23 }
   0xd   :  { %p265_p6 = por %p264_p5, %p263_p4 }
   0xf   :  { %p266_p7 = pnand %p265_p6, %p259_p3 }
  0x11   :  { %269 = shalt.err (!%p266_p7)
}
  0x12   :  { %20 = dma.hbm_to_vmem [thread:$0]  %s395_s0, 64, %s18_s13, [#allocation3]  }
  0x13   :  { %s270_s28 = scalar_lea.hbm %s396_s1, 1024 }
  0x14   :  { %p271_p8 = scmp.ne.s32.totalorder %s396_s1, %s270_s28  ;;  %p274_p9 = scmp.lt.u32.totalorder %s270_s28, %s396_s1 }
  0x16   :  { %p276_p10 = pnand %p274_p9, %p271_p8 }
  0x18   :  { %279 = shalt.err (!%p276_p10)
}
  0x19   :  { %s280_s6 = scalar_lea.vmem %s347_s15, 1024  ;;  %p285_p12 = scmp.lt.s32.totalorder %s347_s15, %s347_s15 }
  0x1a   :  { %p281_p11 = scmp.ne.s32.totalorder %s347_s15, %s280_s6  ;;  %p286_p13 = scmp.lt.s32.totalorder %s280_s6, %s280_s6 }
  0x1c   :  { %p287_p0 = por %p286_p13, %p285_p12 }
  0x1e   :  { %p288_p1 = pnand %p287_p0, %p281_p11 }
  0x20   :  { %291 = shalt.err (!%p288_p1)
}
  0x21   :  { %s322_s0 = smov 64   ;;  %s323_s7 = smov 4  }
  0x22   :  { %32 = dma.hbm_to_vmem [thread:$0]  %s396_s1, 1024, %s347_s15, [#allocation6], %s322_s0, %s322_s0, %s323_s7  }
  0x23   :  { %314 = dma.done.wait [#allocation3], 64  }
  0x24   :  { %315 = vsyncadd [#allocation3], 4294967232 }
  0x25   :  { %316 = dma.done.wait [#allocation6], 1024  }
  0x26   :  { %317 = vsyncadd [#allocation6], 4294966272  ;;  %v324_v0 = vmov 0.0   ;;  %vm325_vm0 = vmmov 0   ;;  %v234_v1 = vld [vmem:[#allocation5] sm:$0xff]   ;;  %v235_v2 = vld [vmem:[#allocation5 + $0x8] sm:$0xff]   ;;  %v154_v10 = vlaneseq }
  0x27   :  { %207 = vmatprep.subr.bf16.mxu0 %v324_v0  ;;  %223 = vmatprep.mubr.msk.bf16.mxu0 %vm325_vm0, %v324_v0  ;;  %v236_v3 = vld [vmem:[#allocation5 + $0x10] sm:$0xff]   ;;  %v237_v4 = vld [vmem:[#allocation5 + $0x18] sm:$0xff]   ;;  %v238_v5 = vld [vmem:[#allocation5 + $0x20] sm:$0xff]  }
  0x28   :  { %208 = vmatpush3.bf16.msra.mxu0 %v234_v1  ;;  %v239_v6 = vld [vmem:[#allocation5 + $0x28] sm:$0xff]   ;;  %v240_v7 = vld [vmem:[#allocation5 + $0x30] sm:$0xff]   ;;  %v241_v8 = vld [vmem:[#allocation5 + $0x38] sm:$0xff]   ;;  %v155_v11 = vand.u32 127, %v154_v10 }
  0x29   :  { %209 = vmatprep.subr.bf16.mxu0 %v324_v0  ;;  %v42_v9 = vld [vmem:[#allocation2] sm:$0xf] }
  0x2a   :  { %v189_v12 = vld [vmem:[%s397_s2] ss:$0 sm:$0xff]  ;;  %vm156_vm1 = vcmp.lt.s32.totalorder %v155_v11, 16  ;;  %s326_s2 = smov [#allocation7]   ;;  %vm169_vm2 = vcmp.eq.s32.totalorder %v155_v11, 16 }
  0x2b   :  { %s179_s11 = sshll.u32 %s326_s2, 4  ;;  %s180_s11 = int_to_ptr.vmem [resolvable:$true] %s179_s11 }
  0x2c   :  { %210 = vmatpush3.bf16.msra.mxu0 %v235_v2  ;;  %s292_s12 = scalar_lea.vmem %s180_s11, 128  ;;  %p297_p3 = scmp.lt.s32.totalorder %s180_s11, %s180_s11 }
  0x2d   :  { %211 = vmatprep.subr.bf16.mxu0 %v324_v0  ;;  %p293_p2 = scmp.ne.s32.totalorder %s180_s11, %s292_s12  ;;  %p298_p4 = scmp.lt.s32.totalorder %s292_s12, %s292_s12 }
  0x2f   :  { %p299_p5 = por %p298_p4, %p297_p3 }
  0x30   :  { %212 = vmatpush3.bf16.msra.mxu0 %v236_v3 }
  0x31   :  { %213 = vmatprep.subr.bf16.mxu0 %v324_v0  ;;  %p300_p6 = pnand %p299_p5, %p293_p2 }
  0x34   :  { %214 = vmatpush3.bf16.msra.mxu0 %v237_v4 }
  0x35   :  { %215 = vmatprep.subr.bf16.mxu0 %v324_v0 }
  0x38   :  { %216 = vmatpush3.bf16.msra.mxu0 %v238_v5 }
  0x39   :  { %217 = vmatprep.subr.bf16.mxu0 %v324_v0 }
  0x3c   :  { %218 = vmatpush3.bf16.msra.mxu0 %v239_v6 }
  0x3d   :  { %219 = vmatprep.subr.bf16.mxu0 %v324_v0 }
  0x40   :  { %220 = vmatpush3.bf16.msra.mxu0 %v240_v7 }
  0x41   :  { %221 = vmatprep.subr.bf16.mxu0 %v324_v0 }
  0x44   :  { %222 = vmatpush3.bf16.msra.mxu0 %v241_v8 }
  0x47   :  { %224 = vmatmul.mubr.bf16.vlgmr.msra.gmra.mrb[0].mxu0 %v42_v9 }
 0x11a   :  { %v148_v13 = vpop.f32.mrb[0].mxu0 }
 0x11b   :  { %v149_v14 = vadd.f32 %v189_v12, %v148_v13  ;;  %v225_v15 = vpop.f32.mrb[1].mxu0 }
 0x11c   :  { %v151_v16 = vpop.f32.mrb[2].mxu0 }
 0x11d   :  { %v226_v17 = vpop.f32.mrb[3].mxu0  ;;  %v157_v18 = vsel %vm156_vm1, %v149_v14, -inf }
 0x11e   :  { %158 = vmax.xlane.f32.xlu0 %v157_v18 }
 0x1ab   :  { %v159_v19 = vpop.xlane.xlu0 %158 }
 0x1ac   :  { %v160_v20 = vsub.f32 %v157_v18, %v159_v19 }
 0x1ae   :  { %v161_v21 = vmul.f32 1.442695, %v160_v20 }
 0x1b0   :  { %242 = vpow2.f32 %v161_v21 }
 0x1ba   :  { %v243_v22 = vpop.eup %242 }
 0x1bb   :  { %163 = vadd.xlane.f32.xlu0 %v243_v22 }
 0x248   :  { %v164_v23 = vpop.xlane.xlu0 %163 }
 0x249   :  { %244 = vlog2.f32 %v164_v23 }
 0x24a   :  { %246 = vtanh.f32 %v149_v14 }
 0x253   :  { %v245_v24 = vpop.eup %244 }
 0x254   :  { %v166_v25 = vmul.f32 0.6931472, %v245_v24  ;;  %v247_v27 = vpop.eup %246 }
 0x256   :  { %v167_v26 = vsub.f32 %v160_v20, %v166_v25 }
 0x258   :  { %v168_v28 = vsel %vm156_vm1, %v167_v26, 0.0 }
 0x259   :  { %v171_v29 = vsel %vm169_vm2, %v247_v27, %v168_v28 }
 0x25a   :  { %172 = vst [vmem:[#allocation7] sm:$0xff] %v171_v29 }
 0x25b   :  { %303 = shalt.err (!%p300_p6)
}
 0x25c   :  { %s304_s15 = scalar_lea.hbm %s398_s3, 128 }
 0x25d   :  { %p305_p7 = scmp.ne.s32.totalorder %s398_s3, %s304_s15  ;;  %p308_p8 = scmp.lt.u32.totalorder %s304_s15, %s398_s3 }
 0x25f   :  { %p310_p9 = pnand %p308_p8, %p305_p7 }
 0x261   :  { %313 = shalt.err (!%p310_p9)
}
 0x262   :  { %182 = dma.vmem_to_hbm [thread:$0]  %s180_s11, 128, %s398_s3, [#allocation4]  }
 0x263   :  { %318 = dma.done.wait [#allocation4], 128  }
 0x264   :  { %319 = vsyncadd [#allocation4], 4294967168 }
 0x265   :  { %186 = vsyncpa [#allocation3], 1 }
 0x266   :  { %187 = vsyncpa [#allocation6], 1 }
 0x267   :  { %188 = vsyncpa [#allocation4], 1 }

</bundles_post_ra>
